<compile_context>
chip_gen: v7x
topology: tpu7x:2x2x1
jax: 0.10.0
libtpu: 0.0.40
codegen_flags: <defaults>
</compile_context>

<pallas_src>
import numpy as np
import jax
import jax.numpy as jnp
from jax.experimental import pallas as pl
from jax.experimental.pallas import tpu as pltpu


def _embed_target_loc_kernel(x_ref, mask_ref, wide_ref, w2_ref, out_ref):
    j = mask_ref.shape[-1]            # J extended joints
    n1 = wide_ref.shape[0] - j        # J*3 + 1 rows of [block-diag W1 ; b1]
    jd = w2_ref.shape[0] - j          # J*D rows of vstacked W2

    # Layer 1 for all joints at once, bias folded via the ones column:
    #   (Bt, J*3+1) @ (J*3+1, J*D) on the MXU, f32 accumulation.
    h = jnp.dot(x_ref[...], wide_ref[:n1, :],
                preferred_element_type=jnp.float32)
    h = h * jax.nn.sigmoid(h)         # SiLU in f32

    # Per-(sample, joint) scale = active_mask * WeightedSum weight, expanded
    # across each joint's D-wide chunk: (Bt, J) @ (J, J*D).
    scale = jnp.dot(mask_ref[...], wide_ref[n1:, :],
                    preferred_element_type=jnp.float32)

    # Layer 2 + masked weighted sum as one concat-K matmul; the masked,
    # ws-scaled bias2 term is a tiny second pass (lane-aligned slab slices,
    # J*D is a multiple of 8/16 so both views are sublane-aligned, zero-cost).
    hs = (h * scale).astype(w2_ref.dtype)
    out = jnp.dot(hs, w2_ref[:jd, :], preferred_element_type=jnp.float32)
    out = out + jnp.dot(mask_ref[...], w2_ref[jd:, :],
                        preferred_element_type=jnp.float32)
    out_ref[...] = out.astype(out_ref.dtype)


def prepare_fused_params(w1, b1, w2, b2, ws_weights, param_dtype=jnp.bfloat16):
    """One-time fold of per-joint params into two packed slabs (2 param DMAs).

    w1: (J, 3, D)  per-joint Linear(3, D) weight (input @ w convention)
    b1: (J, D)
    w2: (J, D, D)  per-joint Linear(D, D) weight
    b2: (J, D)
    ws_weights: (J,) WeightedSum weights
    """
    J, k_in, D = w1.shape
    f32 = jnp.float32
    w1, b1, w2, b2 = (a.astype(f32) for a in (w1, b1, w2, b2))
    ws = ws_weights.astype(f32)
    eye = jnp.eye(J, dtype=f32)
    # Block-diagonal layer-1 weight: row j*3+k, col j*D+d -> w1[j, k, d]
    w1_bd = (eye[:, None, :, None] * w1[:, :, None, :]).reshape(J * k_in, J * D)
    # Expansion matrix scaled by the WeightedSum weights: [j, j*D+d] = ws[j]
    wexp = ws[:, None] * jnp.kron(eye, jnp.ones((1, D), f32))
    # Wide slab: [block-diag W1 ; b1 row (ones-column fold) ; ws-scaled wexp]
    slab_wide = jnp.concatenate([w1_bd, b1.reshape(1, J * D), wexp], axis=0)
    # Narrow slab: [vstacked W2 ; ws-scaled b2]
    slab_w2 = jnp.concatenate([w2.reshape(J * D, D), ws[:, None] * b2], axis=0)
    return slab_wide.astype(param_dtype), slab_w2.astype(param_dtype)


def embed_target_loc_multi(x, mask, fused_params, *, batch_tile=None):
    """
    x:    (B, J, 3) float  per-joint target locations (J = extended joints)
    mask: (B, J)    float  1.0 where joint j (incl. 'heading') is active
    fused_params: output of prepare_fused_params
    batch_tile: None -> single no-grid call (whole problem resident in VMEM;
        the right choice for small B). Otherwise B is tiled over a "parallel"
        grid axis so large batches amortize the fixed call cost and use both
        v7x TensorCores; weight index_maps are constant so slabs stay resident.
    returns: (B, D)
    """
    slab_wide, slab_w2 = fused_params
    B, J, _ = x.shape
    D = slab_w2.shape[1]
    cdt = slab_wide.dtype

    # ones column folds b1 into the first matmul; contiguous reshape otherwise
    x_aug = jnp.concatenate(
        [x.reshape(B, -1), jnp.ones((B, 1), x.dtype)], axis=-1).astype(cdt)
    mask_c = mask.astype(cdt)
    out_shape = jax.ShapeDtypeStruct((B, D), x.dtype)

    if batch_tile is None or batch_tile >= B:
        # Single invocation, no grid: no pipeline machinery / double buffers.
        return pl.pallas_call(
            _embed_target_loc_kernel,
            out_shape=out_shape,
            in_specs=[pl.BlockSpec(memory_space=pltpu.MemorySpace.VMEM)] * 4,
            out_specs=pl.BlockSpec(memory_space=pltpu.MemorySpace.VMEM),
        )(x_aug, mask_c, slab_wide, slab_w2)

    assert B % batch_tile == 0, "pad B to a multiple of batch_tile"
    assert batch_tile % 16 == 0, "keep batch tiles sublane-aligned for bf16"
    return pl.pallas_call(
        _embed_target_loc_kernel,
        out_shape=out_shape,
        grid=(B // batch_tile,),
        in_specs=[
            pl.BlockSpec((batch_tile, x_aug.shape[1]), lambda i: (i, 0)),
            pl.BlockSpec((batch_tile, J), lambda i: (i, 0)),
            pl.BlockSpec(slab_wide.shape, lambda i: (0, 0)),   # resident weights
            pl.BlockSpec(slab_w2.shape, lambda i: (0, 0)),     # resident weights
        ],
        out_specs=pl.BlockSpec((batch_tile, D), lambda i: (i, 0)),
        compiler_params=pltpu.CompilerParams(
            dimension_semantics=("parallel",)),
    )(x_aug, mask_c, slab_wide, slab_w2)


def _reference(x, w1, b1, w2, b2, ws_weights, mask):
    # plain-JAX f32 reference mirroring the PyTorch loop semantics
    h = jnp.einsum('bji,jid->bjd', x, w1) + b1[None]
    h = h * jax.nn.sigmoid(h)
    e = jnp.einsum('bjd,jde->bje', h, w2) + b2[None]
    e = e * mask[:, :, None]                       # inactive joints stay zero
    return jnp.einsum('bjd,j->bd', e, ws_weights)  # WeightedSum


if __name__ == "__main__":
    # module config
    all_goal_joint_names = ['pelvis', 'left_wrist', 'right_wrist']
    extended_goal_joint_names = all_goal_joint_names + ['traj', 'heading']
    joint_idx = {n: i for i, n in enumerate(extended_goal_joint_names)}
    J = len(extended_goal_joint_names)     # 5
    D = 32                                 # latent_dim
    B = 4                                  # batch

    # deterministic parameter init (synthetic; no checkpoint load)
    key = jax.random.PRNGKey(0)
    k_x, k_w1, k_b1, k_w2, k_b2, k_xb, k_mb = jax.random.split(key, 7)
    x = jax.random.normal(k_x, (B, J, 3), dtype=jnp.float32)
    w1 = jax.random.normal(k_w1, (J, 3, D), dtype=jnp.float32) * 0.3
    b1 = jax.random.normal(k_b1, (J, D), dtype=jnp.float32) * 0.05
    w2 = jax.random.normal(k_w2, (J, D, D), dtype=jnp.float32) * 0.1
    b2 = jax.random.normal(k_b2, (J, D), dtype=jnp.float32) * 0.05
    ws_weights = jnp.full((J,), 1.0 / J, dtype=jnp.float32)   # WeightedSum init

    # per-sample active joint names + heading flags -> mask (host-side glue)
    target_joint_names = [
        np.array(['pelvis', 'traj']),
        np.array(['left_wrist']),
        np.array(['right_wrist', 'pelvis', 'traj']),
        np.array([]),
    ]
    target_heading = [True, False, True, True]
    mask_np = np.zeros((B, J), dtype=np.float32)
    for b in range(B):
        names = list(target_joint_names[b])
        if target_heading[b]:
            names.append('heading')
        for name in names:
            mask_np[b, joint_idx[name]] = 1.0
    mask = jnp.asarray(mask_np)

    # one-time fold of per-joint params into two packed bf16 slabs
    fused_params = jax.block_until_ready(
        prepare_fused_params(w1, b1, w2, b2, ws_weights))

    # --- small-batch path: single no-grid call ---
    out = jax.block_until_ready(embed_target_loc_multi(x, mask, fused_params))
    ref = _reference(x, w1, b1, w2, b2, ws_weights, mask)
    assert out.shape == (B, D) and out.dtype == jnp.float32
    # bf16 matmul operands (f32 accumulation) -> loosened tolerance per review
    assert jnp.allclose(out, ref, atol=2e-2, rtol=2e-2), "mismatch (small batch)"

    # --- batched path: amortize the call cost + parallel batch axis (v7x 2 TCs)
    Bb, tile = 256, 128
    xb = jax.random.normal(k_xb, (Bb, J, 3), dtype=jnp.float32)
    maskb = (jax.random.uniform(k_mb, (Bb, J)) < 0.5).astype(jnp.float32)
    outb = jax.block_until_ready(
        embed_target_loc_multi(xb, maskb, fused_params, batch_tile=tile))
    refb = _reference(xb, w1, b1, w2, b2, ws_weights, maskb)
    assert outb.shape == (Bb, D)
    assert jnp.allclose(outb, refb, atol=2e-2, rtol=2e-2), "mismatch (batched)"

    print("KERNEL_OK")
</pallas_src>

<mosaic_0001>
module attributes {stable_mosaic.version = 11 : i64} {
  func.func @_embed_target_loc_kernel(%arg0: memref<4x16xbf16, #tpu.memory_space<vmem>>, %arg1: memref<4x5xbf16, #tpu.memory_space<vmem>>, %arg2: memref<21x160xbf16, #tpu.memory_space<vmem>>, %arg3: memref<165x32xbf16, #tpu.memory_space<vmem>>, %arg4: memref<4x32xf32, #tpu.memory_space<vmem>>) attributes {dimension_semantics = [], scalar_prefetch = 0 : i64, scratch_operands = 0 : i64, tpu.core_type = #tpu.core_type<tc>} {
    %c0 = arith.constant 0 : index
    %c0_0 = arith.constant 0 : index
    %0 = vector.load %arg0[%c0, %c0_0] : memref<4x16xbf16, #tpu.memory_space<vmem>>, vector<4x16xbf16>
    %c0_1 = arith.constant 0 : index
    %c0_2 = arith.constant 0 : index
    %1 = vector.load %arg2[%c0_1, %c0_2] : memref<21x160xbf16, #tpu.memory_space<vmem>>, vector<16x160xbf16>
    %cst = arith.constant dense<0.000000e+00> : vector<4x160xf32>
    %2 = tpu.matmul %0, %1, %cst {dimension_numbers = #tpu.dot_dimension_numbers<[1], [0], [0], [1], [0, 0, 1, 1], [], []>} : vector<4x16xbf16>, vector<16x160xbf16>, vector<4x160xf32> -> vector<4x160xf32>
    %3 = arith.negf %2 : vector<4x160xf32>
    %4 = math.exp %3 : vector<4x160xf32>
    %cst_3 = arith.constant 1.000000e+00 : f32
    %5 = vector.broadcast %cst_3 : f32 to vector<4x160xf32>
    %6 = arith.addf %5, %4 : vector<4x160xf32>
    %7 = arith.divf %5, %6 : vector<4x160xf32>
    %8 = arith.mulf %2, %7 : vector<4x160xf32>
    %c0_4 = arith.constant 0 : index
    %c0_5 = arith.constant 0 : index
    %9 = vector.load %arg1[%c0_4, %c0_5] : memref<4x5xbf16, #tpu.memory_space<vmem>>, vector<4x5xbf16>
    %c16 = arith.constant 16 : index
    %c0_6 = arith.constant 0 : index
    %10 = vector.load %arg2[%c16, %c0_6] : memref<21x160xbf16, #tpu.memory_space<vmem>>, vector<5x160xbf16>
    %cst_7 = arith.constant dense<0.000000e+00> : vector<4x160xf32>
    %11 = tpu.matmul %9, %10, %cst_7 {dimension_numbers = #tpu.dot_dimension_numbers<[1], [0], [0], [1], [0, 0, 1, 1], [], []>} : vector<4x5xbf16>, vector<5x160xbf16>, vector<4x160xf32> -> vector<4x160xf32>
    %12 = arith.mulf %8, %11 : vector<4x160xf32>
    %13 = arith.truncf %12 : vector<4x160xf32> to vector<4x160xbf16>
    %c0_8 = arith.constant 0 : index
    %c0_9 = arith.constant 0 : index
    %14 = vector.load %arg3[%c0_8, %c0_9] : memref<165x32xbf16, #tpu.memory_space<vmem>>, vector<160x32xbf16>
    %cst_10 = arith.constant dense<0.000000e+00> : vector<4x32xf32>
    %15 = tpu.matmul %13, %14, %cst_10 {dimension_numbers = #tpu.dot_dimension_numbers<[1], [0], [0], [1], [0, 0, 1, 1], [], []>} : vector<4x160xbf16>, vector<160x32xbf16>, vector<4x32xf32> -> vector<4x32xf32>
    %c0_11 = arith.constant 0 : index
    %c0_12 = arith.constant 0 : index
    %16 = vector.load %arg1[%c0_11, %c0_12] : memref<4x5xbf16, #tpu.memory_space<vmem>>, vector<4x5xbf16>
    %c160 = arith.constant 160 : index
    %c0_13 = arith.constant 0 : index
    %17 = vector.load %arg3[%c160, %c0_13] : memref<165x32xbf16, #tpu.memory_space<vmem>>, vector<5x32xbf16>
    %cst_14 = arith.constant dense<0.000000e+00> : vector<4x32xf32>
    %18 = tpu.matmul %16, %17, %cst_14 {dimension_numbers = #tpu.dot_dimension_numbers<[1], [0], [0], [1], [0, 0, 1, 1], [], []>} : vector<4x5xbf16>, vector<5x32xbf16>, vector<4x32xf32> -> vector<4x32xf32>
    %19 = arith.addf %15, %18 : vector<4x32xf32>
    %c0_15 = arith.constant 0 : index
    %c0_16 = arith.constant 0 : index
    %20 = vector.load %arg4[%c0_15, %c0_16] : memref<4x32xf32, #tpu.memory_space<vmem>>, vector<4x32xf32>
    tpu.vector_store %arg4[%c0_15, %c0_16], %19 {strides = array<i32>} : memref<4x32xf32, #tpu.memory_space<vmem>>, vector<4x32xf32>,
    return
  }
}

</mosaic_0001>

<bundles_post_ra>
// kernel: tpu_custom_call.1
= control target key start
LH: loop header
LB: loop body
LE: loop exit
PB: predicated region body
PF: predicated region fallthrough
CT: control target
= control target key end

     0   :  { %v422_v2 = vmov 0   ;;  %vm32_vm0 = vcmask 130048   ;;  %vm102_vm1 = vcmask 1041408   ;;  %vm103_vm2 = vcmask 1042432   ;;  %s514_s0 = inlined_call_operand.vmem [shape: bf16[4,16], index: 0, kind: input, shape index: {}]   ;;  %s515_s1 = inlined_call_operand.vmem [shape: bf16[4,5], index: 1, kind: input, shape index: {}]   ;;  %s516_s2 = inlined_call_operand.vmem [shape: bf16[21,160], index: 2, kind: input, shape index: {}]   ;;  %s517_s3 = inlined_call_operand.vmem [shape: bf16[165,32], index: 3, kind: input, shape index: {}]   ;;  %s518_s4 = inlined_call_operand.hbm [shape: f32[4,32], index: 4, kind: output, shape index: {}]  }
   0x1   :  { %v375_v0 = vld [vmem:[%s516_s2 + $0x4] ss:$8 sps:$4 sm:$0xff]   ;;  %v377_v1 = vld [vmem:[%s516_s2] ss:$8 sps:$4 sm:$0xff]   ;;  %68 = vmatprep.mubr.bf16.mxu1 %v422_v2  ;;  %v92_v3 = vld [vmem:[%s516_s2 + $0x10] sm:$0x77]  ;;  %285 = vmatprep.subr.bf16.mxu0 %v422_v2 }
   0x2   :  { %36 = vmatprep.subr.bf16.mxu1 %v375_v0  ;;  %v346_v4 = vcombine.low %v92_v3, %v92_v3  ;;  %v347_v5 = vcombine.high %v92_v3, %v92_v3  ;;  %v19_v6 = vld [vmem:[%s514_s0] sm:$0x3]  ;;  %v423_v8 = vmov 65535  }
   0x3   :  { %37 = vmatpush1.bf16.msra.mxu1 %v377_v1  ;;  %v380_v7 = vld [vmem:[%s517_s3] sm:$0xff]   ;;  %v104_v9 = vsel %vm102_vm1, 4294967295, %v423_v8 }
   0x4   :  { %v105_v10 = vsel %vm103_vm2, %v104_v9, 0  ;;  %286 = vmatpush1.bf16.msra.mxu0 %v380_v7 }
   0x5   :  { %v110_v11 = vand.u32 %v347_v5, %v105_v10  ;;  %v107_v12 = vand.u32 %v346_v4, %v105_v10  ;;  %287 = vmatprep.subr.bf16.mxu0 %v422_v2 }
   0x6   :  { %343 = vmatmul.mubr.msk.bf16.vlgmr.msra.gmra.mrb[0].mxu1 %vm32_vm0, %v19_v6 }
   0x7   :  { %144 = vmatprep.mubr.bf16.mxu1 %v422_v2  ;;  %112 = vmatprep.subr.bf16.mxu1 %v110_v11 }
   0x8   :  { %113 = vmatpush1.bf16.msra.mxu1 %v107_v12 }
   0x9   :  { %9 = vsyncpa [#allocation3], 0  ;;  %v91_v13 = vld [vmem:[%s515_s1] sm:$0x3]  ;;  %vm98_vm3 = vcmask 39936   ;;  %v381_v14 = vld [vmem:[%s517_s3 + $0x8] sm:$0xff]  }
   0xa   :  { %288 = vmatpush1.bf16.msra.mxu0 %v381_v14  ;;  %v382_v15 = vld [vmem:[%s517_s3 + $0x10] sm:$0xff]   ;;  %v383_v16 = vld [vmem:[%s517_s3 + $0x18] sm:$0xff]   ;;  %v384_v17 = vld [vmem:[%s517_s3 + $0x20] sm:$0xff]   ;;  %v424_v24 = vmov 0.0   ;;  %vm425_vm4 = vmmov 0   ;;  %vm281_vm5 = vcmask 261120  }
   0xb   :  { %289 = vmatprep.subr.bf16.mxu0 %v422_v2  ;;  %v385_v18 = vld [vmem:[%s517_s3 + $0x28] sm:$0xff]   ;;  %v386_v19 = vld [vmem:[%s517_s3 + $0x30] sm:$0xff]   ;;  %v387_v20 = vld [vmem:[%s517_s3 + $0x38] sm:$0xff]   ;;  %363 = vmatprep.subr.bf16.mxu1 %v424_v24  ;;  %vm325_vm6 = vcmask 257024  }
   0xc   :  { %v177_v21 = vld [vmem:[%s517_s3 + $0x50] sm:$0x7]  ;;  %v388_v22 = vld [vmem:[%s517_s3 + $0x40] sm:$0xff]   ;;  %v389_v25 = vld [vmem:[%s517_s3 + $0x48] sm:$0xff]   ;;  %s426_s3 = smov [#allocation2]  }
   0xd   :  { %v179_v23 = vand.u32 %v177_v21, %v105_v10  ;;  %s333_s18 = sshll.u32 %s426_s3, 4  ;;  %s334_s18 = int_to_ptr.vmem [resolvable:$true] %s333_s18 }
   0xe   :  { %348 = vmatmul.mubr.msk.bf16.vlgmr.msra.gmra.mrb[4].mxu1 %vm98_vm3, %v91_v13  ;;  %290 = vmatpush1.bf16.msra.mxu0 %v382_v15  ;;  %s398_s19 = scalar_lea.vmem %s334_s18, 64  ;;  %p403_p1 = scmp.lt.s32.totalorder %s334_s18, %s334_s18 }
   0xf   :  { %291 = vmatprep.subr.bf16.mxu0 %v422_v2  ;;  %364 = vmatpush3.bf16.msra.mxu1 %v179_v23  ;;  %p399_p0 = scmp.ne.s32.totalorder %s334_s18, %s398_s19  ;;  %p404_p2 = scmp.lt.s32.totalorder %s398_s19, %s398_s19 }
  0x10   :  { %365 = vmatprep.mubr.msk.bf16.mxu1 %vm425_vm4, %v424_v24 }
  0x11   :  { %p405_p3 = por %p404_p2, %p403_p1 }
  0x12   :  { %292 = vmatpush1.bf16.msra.mxu0 %v383_v16 }
  0x13   :  { %293 = vmatprep.subr.bf16.mxu0 %v422_v2  ;;  %p406_p4 = pnand %p405_p3, %p399_p0 }
  0x16   :  { %294 = vmatpush1.bf16.msra.mxu0 %v384_v17  ;;  %366 = vmatmul.mubr.msk.bf16.vlgmr.msra.gmra.mrb[8].mxu1 %vm98_vm3, %v91_v13 }
  0x17   :  { %295 = vmatprep.subr.bf16.mxu0 %v422_v2 }
  0x1a   :  { %296 = vmatpush1.bf16.msra.mxu0 %v385_v18 }
  0x1b   :  { %297 = vmatprep.subr.bf16.mxu0 %v422_v2 }
  0x1e   :  { %298 = vmatpush1.bf16.msra.mxu0 %v386_v19 }
  0x1f   :  { %299 = vmatprep.subr.bf16.mxu0 %v422_v2 }
  0x22   :  { %300 = vmatpush1.bf16.msra.mxu0 %v387_v20 }
  0x23   :  { %301 = vmatprep.subr.bf16.mxu0 %v422_v2 }
  0x26   :  { %302 = vmatpush1.bf16.msra.mxu0 %v388_v22 }
  0x27   :  { %303 = vmatprep.subr.bf16.mxu0 %v422_v2 }
  0x2a   :  { %304 = vmatpush1.bf16.msra.mxu0 %v389_v25 }
  0xd9   :  { %v70_v26 = vpop.f32.mrb[0].mxu1 }
  0xda   :  { %v344_v27 = vmul.f32 -1.442695, %v70_v26  ;;  %v72_v28 = vpop.f32.mrb[1].mxu1 }
  0xdb   :  { %v345_v29 = vmul.f32 -1.442695, %v72_v28  ;;  %v74_v30 = vpop.f32.mrb[2].mxu1 }
  0xdc   :  { %390 = vpow2.f32 %v344_v27  ;;  %v75_v31 = vpop.f32.mrb[3].mxu1 }
  0xdd   :  { %392 = vpow2.f32 %v345_v29 }
  0xe1   :  { %v146_v32 = vpop.f32.mrb[4].mxu1 }
  0xe2   :  { %v148_v33 = vpop.f32.mrb[5].mxu1 }
  0xe3   :  { %v150_v34 = vpop.f32.mrb[6].mxu1 }
  0xe4   :  { %v151_v35 = vpop.f32.mrb[7].mxu1 }
  0xe6   :  { %v391_v36 = vpop.eup %390 }
  0xe7   :  { %v393_v37 = vpop.eup %392  ;;  %v83_v38 = vadd.f32 1.0, %v391_v36 }
  0xe8   :  { %v84_v39 = vadd.f32 1.0, %v393_v37 }
  0xe9   :  { %394 = vrcp.f32 %v83_v38  ;;  %v215_v48 = vpop.f32.mrb[8].mxu1 }
  0xea   :  { %396 = vrcp.f32 %v84_v39  ;;  %v367_v49 = vpop.f32.mrb[9].mxu1 }
  0xeb   :  { %v218_v50 = vpop.f32.mrb[10].mxu1 }
  0xec   :  { %v368_v51 = vpop.f32.mrb[11].mxu1 }
  0xf3   :  { %v395_v40 = vpop.eup %394 }
  0xf4   :  { %v397_v41 = vpop.eup %396  ;;  %v89_v42 = vmul.f32 %v395_v40, %v70_v26 }
  0xf5   :  { %v90_v43 = vmul.f32 %v397_v41, %v72_v28 }
  0xf6   :  { %v153_v44 = vmul.f32 %v146_v32, %v89_v42 }
  0xf7   :  { %v154_v45 = vmul.f32 %v148_v33, %v90_v43 }
  0xf8   :  { %v155_v47 = vpack.c.bf16 %v153_v44, %v153_v44 }
  0xf9   :  { %v156_v46 = vpack.c.bf16 %v154_v45, %v154_v45 }
  0xfb   :  { %360 = vmatprep.mubr.msk.bf16.mxu0 %vm281_vm5, %v156_v46 }
  0xfc   :  { %318 = vmatmul.mubr.bf16.vlgmr.msra.gmra.mrb[0].mxu0 %v155_v47 }
 0x1cf   :  { %v319_v52 = vpop.f32.mrb[0].mxu0 }
 0x1d0   :  { %v320_v53 = vadd.f32 %v319_v52, %v215_v48  ;;  %v321_v54 = vpop.f32.mrb[1].mxu0 }
 0x1d1   :  { %v322_v55 = vpop.f32.mrb[2].mxu0 }
 0x1d2   :  { %v323_v56 = vpop.f32.mrb[3].mxu0  ;;  %326 = vst.msk [vmem:[#allocation2] sm:$0xf] %vm325_vm6, %v320_v53 }
 0x1d3   :  { %409 = shalt.err (!%p406_p4)
}
 0x1d4   :  { %s410_s22 = scalar_lea.hbm %s518_s4, 64 }
 0x1d5   :  { %p411_p5 = scmp.ne.s32.totalorder %s518_s4, %s410_s22  ;;  %p414_p6 = scmp.lt.u32.totalorder %s410_s22, %s518_s4 }
 0x1d7   :  { %p416_p7 = pnand %p414_p6, %p411_p5 }
 0x1d9   :  { %419 = shalt.err (!%p416_p7)
}
 0x1da   :  { %336 = dma.vmem_to_hbm [thread:$0]  %s334_s18, 64, %s518_s4, [#allocation3]  }
 0x1db   :  { %420 = dma.done.wait [#allocation3], 64  }
 0x1dc   :  { %421 = vsyncadd [#allocation3], 4294967232 }
 0x1dd   :  { %340 = vsyncpa [#allocation3], 1 }

</bundles_post_ra>
